<compile_context>
chip_gen: v7x
topology: tpu7x:2x2x1
jax: 0.10.0
libtpu: 0.0.40
codegen_flags: <defaults>
</compile_context>

<pallas_src>
import functools
import math

import jax
import jax.numpy as jnp
from jax import lax
from jax.experimental import pallas as pl
from jax.experimental.pallas import tpu as pltpu


def _subscale_adacos_kernel(x_ref, inv_ref, w_ref, o_ref, *, precision):
    """One grid step = one class tile; subscale heads are unrolled in-kernel.

    x_ref:   (B, F)      activations (same small block every step)
    inv_ref: (S, 1, tn)  precomputed f32 per-class inverse norms (tiny)
    w_ref:   (S, tn, F)  raw (un-normalized) weights for this class tile
    o_ref:   (B, tn)     max-over-subscales cosine logits
    """
    x = x_ref[...]
    num_subscales = w_ref.shape[0]

    acc = None
    # S is small (typically <= 8): a static unroll keeps the running max in
    # vregs.  TODO(synk): switch to lax.fori_loop(..., unroll=True) carrying
    # the (B, tn) max if S grows large enough to pressure vregs.
    for s in range(num_subscales):
        # x @ w.T without materializing a transpose; f32 accumulation on MXU.
        logits = lax.dot_general(
            x, w_ref[s],
            dimension_numbers=(((1,), (1,)), ((), ())),
            preferred_element_type=jnp.float32,
            precision=precision,
        )                                       # (B, tn) f32
        # Fold the per-class 1/||w|| (and any dequant scale for quantized W)
        # into a single lane-wise multiply.
        logits = logits * inv_ref[s]
        acc = logits if acc is None else jnp.maximum(acc, logits)

    o_ref[...] = acc.astype(o_ref.dtype)


def _vmem_budget(B, F_pad, itemsize):
    """Generation-aware VMEM sizing (128 MiB on v5e/v6e, 64 MiB on v7x)."""
    try:
        cap = int(pltpu.get_tpu_info().vmem_capacity_bytes)
    except Exception:
        cap = 64 * 1024 * 1024            # unknown target: assume the smallest
    # Leave ~25% of physical VMEM for compiler scratch / spills, cap at 100 MiB.
    vmem_limit = min((cap * 3) // 4, 100 * 1024 * 1024)
    # Everything besides the double-buffered W slab: x double-buffer plus a
    # fixed 8 MiB of headroom for the inv / output double-buffers and the
    # per-head (B, tn) f32 temporaries (tiny at inference batch sizes).
    overhead = 2 * B * F_pad * itemsize + 8 * 1024 * 1024
    w_budget = max(vmem_limit - overhead, 4 * 1024 * 1024)
    return int(vmem_limit), int(w_budget)


def _choose_class_tile(S, C, F_pad, itemsize, w_budget_bytes):
    """Largest class tile whose double-buffered W slab fits the budget."""
    per_class = 2 * S * F_pad * itemsize      # 2x = depth-2 pipelining (keep
    if per_class * C <= w_budget_bytes:       # in sync if Buffered(n) changes)
        return C                              # whole class dim in one step
    tn = (w_budget_bytes // per_class) // 128 * 128
    return int(max(tn, 128))                  # lane-aligned unmasked stores


def subscale_adacos(x: jax.Array, w_stacked: jax.Array, *,
                    compute_dtype=None,
                    class_tile: int | None = None,
                    pad_features: bool = True,
                    precision=None) -> jax.Array:
    """label=None forward of SubscaleAdaCos.

    x: (B, F), w_stacked: (S, C, F)  ->  (B, C) float32.
    compute_dtype: e.g. jnp.bfloat16 to halve W HBM streaming on v6e/v7x
      (norms, scaling, accumulation and the max stay float32 in-kernel).
    """
    B, F = x.shape
    S, C, F2 = w_stacked.shape
    assert F == F2 and S >= 1

    # ---- one-time weight prep (hoisted out of the kernel) ------------------
    # rsqrt(max(||w||^2, 1e-24)) == 1 / max(||w||, 1e-12): F.normalize(eps=1e-12)
    # folded into the logits as a per-class scale.
    w_f32 = w_stacked.astype(jnp.float32)
    inv = lax.rsqrt(jnp.maximum(jnp.sum(w_f32 * w_f32, axis=-1), 1e-24))  # (S, C)

    cdt = jnp.dtype(compute_dtype) if compute_dtype is not None else jnp.dtype(jnp.float32)
    if precision is None:
        # f32 parity path keeps HIGHEST; narrow streamed dtypes use the native
        # single-pass MXU mode (HIGHEST would re-promote / multiply passes).
        precision = lax.Precision.HIGHEST if cdt == jnp.float32 else lax.Precision.DEFAULT

    x_c = x.astype(cdt)
    w_c = w_stacked.astype(cdt)

    # Zero-pad the feature (lane / MXU contraction) axis to a multiple of 128:
    # zeros change neither the dot products nor the (already computed) norms.
    F_pad = F
    if pad_features and F % 128 != 0:
        F_pad = ((F + 127) // 128) * 128
        x_c = jnp.pad(x_c, ((0, 0), (0, F_pad - F)))
        w_c = jnp.pad(w_c, ((0, 0), (0, 0), (0, F_pad - F)))

    itemsize = jnp.dtype(cdt).itemsize
    vmem_limit, w_budget = _vmem_budget(B, F_pad, itemsize)
    tn = class_tile if class_tile is not None else _choose_class_tile(
        S, C, F_pad, itemsize, w_budget)

    # Pad the class axis up to a tile multiple; padded classes produce exact
    # zeros (0-weight rows, inv padded with 0) and are sliced off below.
    C_pad = -(-C // tn) * tn
    if C_pad != C:
        w_c = jnp.pad(w_c, ((0, 0), (0, C_pad - C), (0, 0)))
        inv = jnp.pad(inv, ((0, 0), (0, C_pad - C)))
    inv = inv.reshape(S, 1, C_pad).astype(jnp.float32)

    grid = (C_pad // tn,)
    # TODO(synk): when batching past a few rows, add an inner "arbitrary" B
    # axis (tm >= 8, ideally 128) with the class axis kept OUTER and the W
    # index_map ignoring the B index, so each (S, tn, F) slab streams from HBM
    # exactly once per forward.
    out = pl.pallas_call(
        functools.partial(_subscale_adacos_kernel, precision=precision),
        out_shape=jax.ShapeDtypeStruct((B, C_pad), jnp.float32),
        grid_spec=pltpu.PrefetchScalarGridSpec(
            num_scalar_prefetch=0,
            grid=grid,
            in_specs=[
                # x: same small block every step (revisited, not re-streamed).
                pl.BlockSpec((B, F_pad), lambda j: (0, 0)),
                # precomputed inverse norms for this class tile (tiny).
                pl.BlockSpec((S, 1, tn), lambda j: (0, 0, j)),
                # all S heads for one class tile; W streaming dominates HBM.
                pl.BlockSpec((S, tn, F_pad), lambda j: (0, j, 0)),
            ],
            out_specs=pl.BlockSpec((B, tn), lambda j: (0, j)),
        ),
        compiler_params=pltpu.CompilerParams(
            # Class tiles are independent -> lets v7x's 2nd TensorCore share
            # the grid; harmless on single-TC v5e/v6e.
            # TODO(synk): if xprof shows only one TC busy on v7x, switch this
            # axis to pltpu.CORE_PARALLEL.
            dimension_semantics=("parallel",),
            vmem_limit_bytes=vmem_limit,
        ),
    )(x_c, inv, w_c)

    return out if C_pad == C else out[:, :C]


def _xavier_uniform(key, class_size, feature_size):
    # torch.nn.init.xavier_uniform_ for a (class_size, feature_size) matrix:
    # fan_in = feature_size, fan_out = class_size, bound = sqrt(6/(fan_in+fan_out))
    bound = math.sqrt(6.0 / (feature_size + class_size))
    return jax.random.uniform(
        key, (class_size, feature_size), dtype=jnp.float32, minval=-bound, maxval=bound
    )


def _reference(x, w_stacked):
    # pure-JAX reference of the label=None SubscaleAdaCos forward
    norm = jnp.maximum(jnp.linalg.norm(w_stacked, axis=-1, keepdims=True), 1e-12)
    w_n = w_stacked / norm
    logits = jnp.einsum("bf,scf->bcs", x, w_n,
                        precision=lax.Precision.HIGHEST)   # stack at dim=2
    return jnp.max(logits, axis=2)


if __name__ == "__main__":
    feature_size = 32
    class_size = 16
    subscale_size = 4
    batch = 2

    key = jax.random.PRNGKey(0)
    kx, *kws = jax.random.split(key, 1 + subscale_size)

    x = jax.random.normal(kx, (batch, feature_size), dtype=jnp.float32)
    w_stacked = jnp.stack(
        [_xavier_uniform(kw, class_size, feature_size) for kw in kws], axis=0
    )  # (S, C, F)

    ref = _reference(x, w_stacked)

    # f32 parity path (tight check against the reference).
    out = jax.block_until_ready(subscale_adacos(x, w_stacked))
    assert out.shape == (batch, class_size)
    assert jnp.allclose(out, ref, atol=1e-5, rtol=1e-5), "f32 mismatch vs reference"

    # bf16-streamed-W path (halves W HBM traffic); loose smoke check only.
    out_bf16 = jax.block_until_ready(
        subscale_adacos(x, w_stacked, compute_dtype=jnp.bfloat16))
    assert out_bf16.shape == (batch, class_size)
    assert bool(jnp.all(jnp.isfinite(out_bf16)))
    assert float(jnp.max(jnp.abs(out_bf16 - ref))) < 0.25, "bf16 path out of tolerance"

    print("KERNEL_OK")
</pallas_src>

<mosaic_0001>
module attributes {stable_mosaic.version = 11 : i64} {
  func.func @_subscale_adacos_kernel(%arg0: i32, %arg1: memref<2x128xf32, #tpu.memory_space<vmem>>, %arg2: memref<4x1x16xf32, #tpu.memory_space<vmem>>, %arg3: memref<4x16x128xf32, #tpu.memory_space<vmem>>, %arg4: memref<2x16xf32, #tpu.memory_space<vmem>>) attributes {dimension_semantics = [#tpu.dimension_semantics<parallel>], iteration_bounds = array<i64: 1>, scalar_prefetch = 0 : i64, scratch_operands = 0 : i64, tpu.core_type = #tpu.core_type<tc>, window_params = [{pipeline_mode = #tpu.pipeline_mode<synchronous>, transform_indices = @transform_0, window_bounds = array<i64: 2, 128>}, {transform_indices = @transform_1, window_bounds = array<i64: 4, 1, 16>}, {transform_indices = @transform_2, window_bounds = array<i64: 4, 16, 128>}, {transform_indices = @transform_3, window_bounds = array<i64: 2, 16>}]} {
    %c0 = arith.constant 0 : index
    %c0_0 = arith.constant 0 : index
    %0 = vector.load %arg1[%c0, %c0_0] : memref<2x128xf32, #tpu.memory_space<vmem>>, vector<2x128xf32>
    %c0_1 = arith.constant 0 : index
    %c0_2 = arith.constant 0 : index
    %c0_3 = arith.constant 0 : index
    %1 = vector.load %arg3[%c0_1, %c0_2, %c0_3] : memref<4x16x128xf32, #tpu.memory_space<vmem>>, vector<1x16x128xf32>
    %2 = vector.shape_cast %1 : vector<1x16x128xf32> to vector<16x128xf32>
    %cst = arith.constant dense<0.000000e+00> : vector<2x16xf32>
    %3 = tpu.matmul %0, %2, %cst {dimension_numbers = #tpu.dot_dimension_numbers<[1], [1], [0], [0], [0, 0, 1, 0], [], []>, precision = #tpu.contract_precision<fp32>} : vector<2x128xf32>, vector<16x128xf32>, vector<2x16xf32> -> vector<2x16xf32>
    %c0_4 = arith.constant 0 : index
    %c0_5 = arith.constant 0 : index
    %c0_6 = arith.constant 0 : index
    %4 = vector.load %arg2[%c0_4, %c0_5, %c0_6] : memref<4x1x16xf32, #tpu.memory_space<vmem>>, vector<1x1x16xf32>
    %5 = vector.shape_cast %4 : vector<1x1x16xf32> to vector<1x16xf32>
    %6 = vector.broadcast %5 : vector<1x16xf32> to vector<2x16xf32>
    %7 = arith.mulf %3, %6 : vector<2x16xf32>
    %c1 = arith.constant 1 : index
    %c0_7 = arith.constant 0 : index
    %c0_8 = arith.constant 0 : index
    %8 = vector.load %arg3[%c1, %c0_7, %c0_8] : memref<4x16x128xf32, #tpu.memory_space<vmem>>, vector<1x16x128xf32>
    %9 = vector.shape_cast %8 : vector<1x16x128xf32> to vector<16x128xf32>
    %cst_9 = arith.constant dense<0.000000e+00> : vector<2x16xf32>
    %10 = tpu.matmul %0, %9, %cst_9 {dimension_numbers = #tpu.dot_dimension_numbers<[1], [1], [0], [0], [0, 0, 1, 0], [], []>, precision = #tpu.contract_precision<fp32>} : vector<2x128xf32>, vector<16x128xf32>, vector<2x16xf32> -> vector<2x16xf32>
    %c1_10 = arith.constant 1 : index
    %c0_11 = arith.constant 0 : index
    %c0_12 = arith.constant 0 : index
    %11 = vector.load %arg2[%c1_10, %c0_11, %c0_12] : memref<4x1x16xf32, #tpu.memory_space<vmem>>, vector<1x1x16xf32>
    %12 = vector.shape_cast %11 : vector<1x1x16xf32> to vector<1x16xf32>
    %13 = vector.broadcast %12 : vector<1x16xf32> to vector<2x16xf32>
    %14 = arith.mulf %10, %13 : vector<2x16xf32>
    %15 = arith.maximumf %7, %14 : vector<2x16xf32>
    %c2 = arith.constant 2 : index
    %c0_13 = arith.constant 0 : index
    %c0_14 = arith.constant 0 : index
    %16 = vector.load %arg3[%c2, %c0_13, %c0_14] : memref<4x16x128xf32, #tpu.memory_space<vmem>>, vector<1x16x128xf32>
    %17 = vector.shape_cast %16 : vector<1x16x128xf32> to vector<16x128xf32>
    %cst_15 = arith.constant dense<0.000000e+00> : vector<2x16xf32>
    %18 = tpu.matmul %0, %17, %cst_15 {dimension_numbers = #tpu.dot_dimension_numbers<[1], [1], [0], [0], [0, 0, 1, 0], [], []>, precision = #tpu.contract_precision<fp32>} : vector<2x128xf32>, vector<16x128xf32>, vector<2x16xf32> -> vector<2x16xf32>
    %c2_16 = arith.constant 2 : index
    %c0_17 = arith.constant 0 : index
    %c0_18 = arith.constant 0 : index
    %19 = vector.load %arg2[%c2_16, %c0_17, %c0_18] : memref<4x1x16xf32, #tpu.memory_space<vmem>>, vector<1x1x16xf32>
    %20 = vector.shape_cast %19 : vector<1x1x16xf32> to vector<1x16xf32>
    %21 = vector.broadcast %20 : vector<1x16xf32> to vector<2x16xf32>
    %22 = arith.mulf %18, %21 : vector<2x16xf32>
    %23 = arith.maximumf %15, %22 : vector<2x16xf32>
    %c3 = arith.constant 3 : index
    %c0_19 = arith.constant 0 : index
    %c0_20 = arith.constant 0 : index
    %24 = vector.load %arg3[%c3, %c0_19, %c0_20] : memref<4x16x128xf32, #tpu.memory_space<vmem>>, vector<1x16x128xf32>
    %25 = vector.shape_cast %24 : vector<1x16x128xf32> to vector<16x128xf32>
    %cst_21 = arith.constant dense<0.000000e+00> : vector<2x16xf32>
    %26 = tpu.matmul %0, %25, %cst_21 {dimension_numbers = #tpu.dot_dimension_numbers<[1], [1], [0], [0], [0, 0, 1, 0], [], []>, precision = #tpu.contract_precision<fp32>} : vector<2x128xf32>, vector<16x128xf32>, vector<2x16xf32> -> vector<2x16xf32>
    %c3_22 = arith.constant 3 : index
    %c0_23 = arith.constant 0 : index
    %c0_24 = arith.constant 0 : index
    %27 = vector.load %arg2[%c3_22, %c0_23, %c0_24] : memref<4x1x16xf32, #tpu.memory_space<vmem>>, vector<1x1x16xf32>
    %28 = vector.shape_cast %27 : vector<1x1x16xf32> to vector<1x16xf32>
    %29 = vector.broadcast %28 : vector<1x16xf32> to vector<2x16xf32>
    %30 = arith.mulf %26, %29 : vector<2x16xf32>
    %31 = arith.maximumf %23, %30 : vector<2x16xf32>
    %c0_25 = arith.constant 0 : index
    %c0_26 = arith.constant 0 : index
    %32 = vector.load %arg4[%c0_25, %c0_26] : memref<2x16xf32, #tpu.memory_space<vmem>>, vector<2x16xf32>
    tpu.vector_store %arg4[%c0_25, %c0_26], %31 {strides = array<i32>} : memref<2x16xf32, #tpu.memory_space<vmem>>, vector<2x16xf32>,
    return
  }
  func.func @transform_0(%arg0: i32) -> (i32, i32) {
    %c0_i32 = arith.constant 0 : i32
    %c0_i32_0 = arith.constant 0 : i32
    %c0_i32_1 = arith.constant 0 : i32
    return %c0_i32, %c0_i32_0 : i32, i32
  }
  func.func @transform_1(%arg0: i32) -> (i32, i32, i32) {
    %c0_i32 = arith.constant 0 : i32
    %c0_i32_0 = arith.constant 0 : i32
    %c0_i32_1 = arith.constant 0 : i32
    return %c0_i32, %c0_i32_0, %arg0 : i32, i32, i32
  }
  func.func @transform_2(%arg0: i32) -> (i32, i32, i32) {
    %c0_i32 = arith.constant 0 : i32
    %c0_i32_0 = arith.constant 0 : i32
    %c0_i32_1 = arith.constant 0 : i32
    return %c0_i32, %arg0, %c0_i32_0 : i32, i32, i32
  }
  func.func @transform_3(%arg0: i32) -> (i32, i32) {
    %c0_i32 = arith.constant 0 : i32
    %c0_i32_0 = arith.constant 0 : i32
    return %c0_i32, %arg0 : i32, i32
  }
}

</mosaic_0001>

<bundles_post_ra>
// kernel: tpu_custom_call.1
= control target key start
LH: loop header
LB: loop body
LE: loop exit
PB: predicated region body
PF: predicated region fallthrough
CT: control target
= control target key end

     0   :  { %8 = vsyncpa [#allocation3], 0  ;;  %s2621_s0 = inlined_call_operand.hbm [shape: f32[2,128], index: 0, kind: input, shape index: {}]   ;;  %s2622_s1 = inlined_call_operand.hbm [shape: f32[4,1,16], index: 1, kind: input, shape index: {}]   ;;  %s2623_s2 = inlined_call_operand.hbm [shape: f32[4,16,128], index: 2, kind: input, shape index: {}]   ;;  %s2624_s3 = inlined_call_operand.hbm [shape: f32[2,16], index: 3, kind: output, shape index: {}]  }
   0x1   :  { %9 = vsyncpa [#allocation6], 0 }
   0x2   :  { %10 = vsyncpa [#allocation4], 0  ;;  %s2419_s12 = smov [#allocation5]   ;;  %s2325_s16 = scalar_lea.hbm %s2622_s1, 64 }
   0x3   :  { %s26_s13 = sshll.u32 %s2419_s12, 4  ;;  %p2326_p0 = scmp.ne.s32.totalorder %s2622_s1, %s2325_s16  ;;  %s27_s13 = int_to_ptr.vmem [resolvable:$true] %s26_s13 }
   0x4   :  { %p2329_p1 = scmp.lt.u32.totalorder %s2325_s16, %s2622_s1 }
   0x6   :  { %p2331_p2 = pnand %p2329_p1, %p2326_p0 }
   0x8   :  { %2334 = shalt.err (!%p2331_p2)
}
   0x9   :  { %s2335_s21 = scalar_lea.vmem %s27_s13, 64  ;;  %p2340_p4 = scmp.lt.s32.totalorder %s27_s13, %s27_s13 }
   0xa   :  { %p2336_p3 = scmp.ne.s32.totalorder %s27_s13, %s2335_s21  ;;  %p2341_p5 = scmp.lt.s32.totalorder %s2335_s21, %s2335_s21 }
   0xc   :  { %p2342_p6 = por %p2341_p5, %p2340_p4 }
   0xe   :  { %p2343_p7 = pnand %p2342_p6, %p2336_p3 }
  0x10   :  { %2346 = shalt.err (!%p2343_p7)
}
  0x11   :  { %s2420_s22 = smov 16   ;;  %s2421_s23 = smov 1  }
  0x12   :  { %32 = dma.hbm_to_vmem [thread:$0]  %s2622_s1, 64, %s27_s13, [#allocation6], %s2420_s22, %s2420_s22, %s2421_s23  }
  0x13   :  { %s2422_s26 = smov [#allocation2]   ;;  %s2423_s28 = smov [#allocation7]  }
  0x14   :  { %s17_s27 = sshll.u32 %s2422_s26, 4  ;;  %s38_s29 = sshll.u32 %s2423_s28, 4  ;;  %s18_s27 = int_to_ptr.vmem [resolvable:$true] %s17_s27  ;;  %s39_s29 = int_to_ptr.vmem [resolvable:$true] %s38_s29 }
  0x15   :  { %s2347_s5 = scalar_lea.hbm %s2621_s0, 32 }
  0x16   :  { %p2348_p8 = scmp.ne.s32.totalorder %s2621_s0, %s2347_s5  ;;  %p2351_p9 = scmp.lt.u32.totalorder %s2347_s5, %s2621_s0 }
  0x18   :  { %p2353_p10 = pnand %p2351_p9, %p2348_p8 }
  0x1a   :  { %2356 = shalt.err (!%p2353_p10)
}
  0x1b   :  { %s2357_s1 = scalar_lea.vmem %s18_s27, 32  ;;  %p2362_p12 = scmp.lt.s32.totalorder %s18_s27, %s18_s27 }
  0x1c   :  { %p2358_p11 = scmp.ne.s32.totalorder %s18_s27, %s2357_s1  ;;  %p2363_p13 = scmp.lt.s32.totalorder %s2357_s1, %s2357_s1 }
  0x1e   :  { %p2364_p0 = por %p2363_p13, %p2362_p12 }
  0x20   :  { %p2365_p1 = pnand %p2364_p0, %p2358_p11 }
  0x22   :  { %2368 = shalt.err (!%p2365_p1)
}
  0x23   :  { %20 = dma.hbm_to_vmem [thread:$0]  %s2621_s0, 32, %s18_s27, [#allocation3]  }
  0x24   :  { %s2369_s14 = scalar_lea.hbm %s2623_s2, 1024 }
  0x25   :  { %p2370_p2 = scmp.ne.s32.totalorder %s2623_s2, %s2369_s14  ;;  %p2373_p3 = scmp.lt.u32.totalorder %s2369_s14, %s2623_s2 }
  0x27   :  { %p2375_p4 = pnand %p2373_p3, %p2370_p2 }
  0x29   :  { %2378 = shalt.err (!%p2375_p4)
}
  0x2a   :  { %s2379_s19 = scalar_lea.vmem %s39_s29, 1024  ;;  %p2384_p6 = scmp.lt.s32.totalorder %s39_s29, %s39_s29 }
  0x2b   :  { %p2380_p5 = scmp.ne.s32.totalorder %s39_s29, %s2379_s19  ;;  %p2385_p7 = scmp.lt.s32.totalorder %s2379_s19, %s2379_s19 }
  0x2d   :  { %p2386_p8 = por %p2385_p7, %p2384_p6 }
  0x2f   :  { %p2387_p9 = pnand %p2386_p8, %p2380_p5 }
  0x31   :  { %2390 = shalt.err (!%p2387_p9)
}
  0x32   :  { %s2424_s0 = smov 128   ;;  %s2425_s20 = smov 8  }
  0x33   :  { %44 = dma.hbm_to_vmem [thread:$0]  %s2623_s2, 1024, %s39_s29, [#allocation6], %s2424_s0, %s2424_s0, %s2425_s20  }
  0x34   :  { %2413 = dma.done.wait [#allocation3], 32  }
  0x35   :  { %2414 = vsyncadd [#allocation3], 4294967264 }
  0x36   :  { %2415 = dma.done.wait [#allocation6], 1088  }
  0x37   :  { %2416 = vsyncadd [#allocation6], 4294966208  ;;  %v2426_v0 = vmov 0.0|0.0   ;;  %vm2427_vm0 = vmmov 0   ;;  %v2428_v1 = vmov 0.0   ;;  %v55_v2 = vld [vmem:[#allocation7] sm:$0xff] }
  0x38   :  { %2202 = vmatprep.subr.bf16.mxu0 %v2426_v0  ;;  %2220 = vmatprep.subr.bf16.mxu1 %v2426_v0  ;;  %v56_v3 = vld [vmem:[#allocation7 + $0x8] sm:$0xff]  ;;  %v525_v4 = vld [vmem:[#allocation7 + $0x10] sm:$0xff]  ;;  %v58_v5 = vand.u32 4294901760, %v55_v2  ;;  %v526_v7 = vld [vmem:[#allocation7 + $0x18] sm:$0xff]  ;;  %s2429_s2 = smov [#allocation8]   ;;  %vm1940_vm1 = vcmask 123904  }
  0x39   :  { %2038 = vmatprep.mubr.msk.f32.mxu0 %vm2427_vm0, %v2428_v1  ;;  %2080 = vmatprep.mubr.msk.f32.mxu1 %vm2427_vm0, %v2428_v1  ;;  %v61_v6 = vand.u32 4294901760, %v56_v3  ;;  %v528_v8 = vand.u32 4294901760, %v525_v4  ;;  %v54_v9 = vld [vmem:[#allocation2] sm:$0x3]  ;;  %v531_v10 = vand.u32 4294901760, %v526_v7  ;;  %v997_v40 = vld [vmem:[#allocation7 + $0x20] sm:$0xff] }
  0x3a   :  { %v2492_v11 = vand.u32 4294901760, %v54_v9  ;;  %v136_v13 = vsub.f32 %v55_v2, %v58_v5  ;;  %v998_v41 = vld [vmem:[#allocation7 + $0x28] sm:$0xff]  ;;  %v1469_v42 = vld [vmem:[#allocation7 + $0x30] sm:$0xff]  ;;  %v1470_v43 = vld [vmem:[#allocation7 + $0x38] sm:$0xff]  ;;  %v1000_v44 = vand.u32 4294901760, %v997_v40  ;;  %s1948_s23 = sshll.u32 %s2429_s2, 4  ;;  %s1949_s23 = int_to_ptr.vmem [resolvable:$true] %s1948_s23 }
  0x3b   :  { %v2494_v12 = vpack.c.bf16 %v61_v6, %v58_v5  ;;  %v143_v14 = vsub.f32 %v56_v3, %v61_v6  ;;  %v606_v15 = vsub.f32 %v525_v4, %v528_v8  ;;  %v2496_v16 = vpack.c.bf16 %v531_v10, %v528_v8  ;;  %s2391_s24 = scalar_lea.vmem %s1949_s23, 32  ;;  %p2396_p11 = scmp.lt.s32.totalorder %s1949_s23, %s1949_s23 }
  0x3c   :  { %v613_v17 = vsub.f32 %v526_v7, %v531_v10  ;;  %v2499_v18 = vsub.f32 %v54_v9, %v2492_v11  ;;  %v137_v19 = vand.u32 4294901760, %v136_v13  ;;  %v1003_v45 = vand.u32 4294901760, %v998_v41  ;;  %v1958_v10 = vld [vmem:[#allocation5] ss:$0 sm:$0xff]  ;;  %p2392_p10 = scmp.ne.s32.totalorder %s1949_s23, %s2391_s24  ;;  %p2397_p12 = scmp.lt.s32.totalorder %s2391_s24, %s2391_s24 }
  0x3d   :  { %2204 = vmatpush3.bf16.xpose.msra.mxu0 %v2494_v12  ;;  %v144_v20 = vand.u32 4294901760, %v143_v14  ;;  %v607_v21 = vand.u32 4294901760, %v606_v15  ;;  %2222 = vmatpush3.bf16.xpose.msra.mxu1 %v2496_v16  ;;  %v2209_v36 = vpack.c.bf16 %v143_v14, %v136_v13  ;;  %v1472_v46 = vand.u32 4294901760, %v1469_v42 }
  0x3e   :  { %v2504_v22 = vand.u32 4294901760, %v2499_v18  ;;  %2205 = vmatprep.subr.bf16.mxu0 %v2426_v0  ;;  %v614_v23 = vand.u32 4294901760, %v613_v17  ;;  %2223 = vmatprep.subr.bf16.mxu1 %v2426_v0  ;;  %v138_v24 = vsub.f32 %v136_v13, %v137_v19  ;;  %v2227_v37 = vpack.c.bf16 %v613_v17, %v606_v15  ;;  %p2398_p13 = por %p2397_p12, %p2396_p11 }
  0x3f   :  { %v145_v25 = vsub.f32 %v143_v14, %v144_v20  ;;  %v608_v26 = vsub.f32 %v606_v15, %v607_v21  ;;  %v2215_v38 = vpack.c.bf16 %v144_v20, %v137_v19  ;;  %v1475_v47 = vand.u32 4294901760, %v1470_v43  ;;  %v1960_v19 = vld [vmem:[#allocation5 + $0x2] ss:$0 sm:$0xff] }
  0x40   :  { %v127_v27 = vsub.f32 %v2499_v18, %v2504_v22  ;;  %v615_v28 = vsub.f32 %v613_v17, %v614_v23  ;;  %v139_v29 = vand.u32 4294901760, %v138_v24  ;;  %v2233_v39 = vpack.c.bf16 %v614_v23, %v607_v21  ;;  %v1961_v21 = vld [vmem:[#allocation5 + $0x3] ss:$0 sm:$0xff]  ;;  %p2399_p0 = pnand %p2398_p13, %p2392_p10 }
  0x41   :  { %v146_v30 = vand.u32 4294901760, %v145_v25  ;;  %v609_v31 = vand.u32 4294901760, %v608_v26  ;;  %v2546_v48 = vsub.f32 %v997_v40, %v1000_v44  ;;  %v1085_v49 = vsub.f32 %v998_v41, %v1003_v45 }
  0x42   :  { %v2510_v32 = vand.u32 4294901760, %v127_v27  ;;  %v616_v33 = vand.u32 4294901760, %v615_v28  ;;  %v1550_v50 = vsub.f32 %v1469_v42, %v1472_v46  ;;  %v1557_v51 = vsub.f32 %v1470_v43, %v1475_v47 }
  0x43   :  { %v2206_v34 = vpack.c.bf16 %v146_v30, %v139_v29  ;;  %v1079_v52 = vand.u32 4294901760, %v2546_v48  ;;  %v1086_v53 = vand.u32 4294901760, %v1085_v49  ;;  %v2239_v56 = vpack.c.bf16 %v1003_v45, %v1000_v44 }
  0x44   :  { %2039 = vmatmul.mubr.f32.vlgmr.msra.gmra.mrb[0].mxu0 %v2510_v32  ;;  %v2224_v35 = vpack.c.bf16 %v616_v33, %v609_v31  ;;  %2081 = vmatmul.mubr.f32.vlgmr.msra.gmra.mrb[0].mxu1 %v2510_v32  ;;  %v1551_v54 = vand.u32 4294901760, %v1550_v50  ;;  %v1558_v55 = vand.u32 4294901760, %v1557_v51  ;;  %v2257_v59 = vpack.c.bf16 %v1475_v47, %v1472_v46 }
  0x45   :  { %2207 = vmatpush3.bf16.xpose.msra.mxu0 %v2206_v34  ;;  %2045 = vmatprep.mubr.msk.f32.mxu0 %vm2427_vm0, %v2428_v1  ;;  %v1080_v57 = vsub.f32 %v2546_v48, %v1079_v52  ;;  %v1087_v58 = vsub.f32 %v1085_v49, %v1086_v53  ;;  %v2245_v6 = vpack.c.bf16 %v1085_v49, %v2546_v48 }
  0x46   :  { %2225 = vmatpush3.bf16.xpose.msra.mxu1 %v2224_v35  ;;  %2087 = vmatprep.mubr.msk.f32.mxu1 %vm2427_vm0, %v2428_v1  ;;  %v1552_v60 = vsub.f32 %v1550_v50, %v1551_v54  ;;  %v1559_v61 = vsub.f32 %v1557_v51, %v1558_v55  ;;  %v2263_v7 = vpack.c.bf16 %v1557_v51, %v1550_v50 }
  0x47   :  { %2208 = vmatprep.subr.bf16.mxu0 %v2426_v0  ;;  %2226 = vmatprep.subr.bf16.mxu1 %v2426_v0  ;;  %v1081_v62 = vand.u32 4294901760, %v1080_v57  ;;  %v1088_v63 = vand.u32 4294901760, %v1087_v58  ;;  %v2251_v8 = vpack.c.bf16 %v1086_v53, %v1079_v52  ;;  %v2269_v9 = vpack.c.bf16 %v1558_v55, %v1551_v54 }
  0x48   :  { %v1553_v2 = vand.u32 4294901760, %v1552_v60  ;;  %v1560_v3 = vand.u32 4294901760, %v1559_v61 }
  0x49   :  { %v2242_v4 = vpack.c.bf16 %v1088_v63, %v1081_v62 }
  0x4a   :  { %v2260_v5 = vpack.c.bf16 %v1560_v3, %v1553_v2 }
  0x4c   :  { %2046 = vmatmul.mubr.f32.vlgmr.msra.gmra.mrb[0].mxu0 %v2492_v11 }
  0x4d   :  { %2088 = vmatmul.mubr.f32.vlgmr.msra.gmra.mrb[0].mxu1 %v2492_v11  ;;  %2210 = vmatpush3.bf16.xpose.msra.mxu0 %v2209_v36 }
  0x4e   :  { %2228 = vmatpush3.bf16.xpose.msra.mxu1 %v2227_v37  ;;  %2052 = vmatprep.mubr.msk.f32.mxu0 %vm2427_vm0, %v2428_v1 }
  0x4f   :  { %2094 = vmatprep.mubr.msk.f32.mxu1 %vm2427_vm0, %v2428_v1  ;;  %2211 = vmatprep.subr.bf16.mxu0 %v2426_v0 }
  0x50   :  { %2229 = vmatprep.subr.bf16.mxu1 %v2426_v0 }
  0x54   :  { %2053 = vmatmul.mubr.f32.vlgmr.msra.gmra.mrb[0].mxu0 %v2499_v18 }
  0x55   :  { %2095 = vmatmul.mubr.f32.vlgmr.msra.gmra.mrb[0].mxu1 %v2499_v18  ;;  %2213 = vmatpush3.bf16.xpose.msra.mxu0 %v2494_v12 }
  0x56   :  { %2231 = vmatpush3.bf16.xpose.msra.mxu1 %v2496_v16  ;;  %2059 = vmatprep.mubr.msk.f32.mxu0 %vm2427_vm0, %v2428_v1 }
  0x57   :  { %2101 = vmatprep.mubr.msk.f32.mxu1 %vm2427_vm0, %v2428_v1  ;;  %2214 = vmatprep.subr.bf16.mxu0 %v2426_v0 }
  0x58   :  { %2232 = vmatprep.subr.bf16.mxu1 %v2426_v0 }
  0x5c   :  { %2060 = vmatmul.mubr.f32.vlgmr.msra.gmra.mrb[0].mxu0 %v2504_v22 }
  0x5d   :  { %2102 = vmatmul.mubr.f32.vlgmr.msra.gmra.mrb[0].mxu1 %v2504_v22  ;;  %2216 = vmatpush3.bf16.xpose.msra.mxu0 %v2215_v38 }
  0x5e   :  { %2234 = vmatpush3.bf16.xpose.msra.mxu1 %v2233_v39  ;;  %2066 = vmatprep.mubr.msk.f32.mxu0 %vm2427_vm0, %v2428_v1 }
  0x5f   :  { %2108 = vmatprep.mubr.msk.f32.mxu1 %vm2427_vm0, %v2428_v1  ;;  %2217 = vmatprep.subr.bf16.mxu0 %v2426_v0 }
  0x60   :  { %2235 = vmatprep.subr.bf16.mxu1 %v2426_v0 }
  0x64   :  { %2067 = vmatmul.mubr.f32.vlgmr.msra.gmra.mrb[0].mxu0 %v2492_v11 }
  0x65   :  { %2109 = vmatmul.mubr.f32.vlgmr.msra.gmra.mrb[0].mxu1 %v2492_v11  ;;  %2219 = vmatpush3.bf16.xpose.msra.mxu0 %v2494_v12  ;;  %v1959_v12 = vld [vmem:[#allocation5 + $0x1] ss:$0 sm:$0xff] }
  0x66   :  { %2237 = vmatpush3.bf16.xpose.msra.mxu1 %v2496_v16  ;;  %2073 = vmatprep.mubr.msk.f32.mxu0 %vm2427_vm0, %v2428_v1 }
  0x67   :  { %2115 = vmatprep.mubr.msk.f32.mxu1 %vm2427_vm0, %v2428_v1  ;;  %2238 = vmatprep.subr.bf16.mxu0 %v2426_v0 }
  0x68   :  { %2256 = vmatprep.subr.bf16.mxu1 %v2426_v0 }
  0x6c   :  { %2074 = vmatmul.mubr.f32.vlgmr.msra.gmra.mrb[0].mxu0 %v2492_v11 }
  0x6d   :  { %2116 = vmatmul.mubr.f32.vlgmr.msra.gmra.mrb[0].mxu1 %v2492_v11  ;;  %2240 = vmatpush3.bf16.xpose.msra.mxu0 %v2239_v56 }
  0x6e   :  { %2258 = vmatpush3.bf16.xpose.msra.mxu1 %v2257_v59  ;;  %2122 = vmatprep.mubr.msk.f32.mxu0 %vm2427_vm0, %v2428_v1 }
  0x6f   :  { %2164 = vmatprep.mubr.msk.f32.mxu1 %vm2427_vm0, %v2428_v1  ;;  %2241 = vmatprep.subr.bf16.mxu0 %v2426_v0 }
  0x70   :  { %2259 = vmatprep.subr.bf16.mxu1 %v2426_v0 }
  0x74   :  { %2123 = vmatmul.mubr.f32.vlgmr.msra.gmra.mrb[2].mxu0 %v2510_v32 }
  0x75   :  { %2165 = vmatmul.mubr.f32.vlgmr.msra.gmra.mrb[2].mxu1 %v2510_v32  ;;  %2243 = vmatpush3.bf16.xpose.msra.mxu0 %v2242_v4 }
  0x76   :  { %2261 = vmatpush3.bf16.xpose.msra.mxu1 %v2260_v5  ;;  %2129 = vmatprep.mubr.msk.f32.mxu0 %vm2427_vm0, %v2428_v1 }
  0x77   :  { %2171 = vmatprep.mubr.msk.f32.mxu1 %vm2427_vm0, %v2428_v1  ;;  %2244 = vmatprep.subr.bf16.mxu0 %v2426_v0 }
  0x78   :  { %2262 = vmatprep.subr.bf16.mxu1 %v2426_v0 }
  0x7c   :  { %2130 = vmatmul.mubr.f32.vlgmr.msra.gmra.mrb[2].mxu0 %v2492_v11 }
  0x7d   :  { %2172 = vmatmul.mubr.f32.vlgmr.msra.gmra.mrb[2].mxu1 %v2492_v11  ;;  %2246 = vmatpush3.bf16.xpose.msra.mxu0 %v2245_v6 }
  0x7e   :  { %2264 = vmatpush3.bf16.xpose.msra.mxu1 %v2263_v7  ;;  %2136 = vmatprep.mubr.msk.f32.mxu0 %vm2427_vm0, %v2428_v1 }
  0x7f   :  { %2178 = vmatprep.mubr.msk.f32.mxu1 %vm2427_vm0, %v2428_v1  ;;  %2247 = vmatprep.subr.bf16.mxu0 %v2426_v0 }
  0x80   :  { %2265 = vmatprep.subr.bf16.mxu1 %v2426_v0 }
  0x84   :  { %2137 = vmatmul.mubr.f32.vlgmr.msra.gmra.mrb[2].mxu0 %v2499_v18 }
  0x85   :  { %2179 = vmatmul.mubr.f32.vlgmr.msra.gmra.mrb[2].mxu1 %v2499_v18  ;;  %2249 = vmatpush3.bf16.xpose.msra.mxu0 %v2239_v56 }
  0x86   :  { %2267 = vmatpush3.bf16.xpose.msra.mxu1 %v2257_v59  ;;  %2143 = vmatprep.mubr.msk.f32.mxu0 %vm2427_vm0, %v2428_v1 }
  0x87   :  { %2185 = vmatprep.mubr.msk.f32.mxu1 %vm2427_vm0, %v2428_v1  ;;  %2250 = vmatprep.subr.bf16.mxu0 %v2426_v0 }
  0x88   :  { %2268 = vmatprep.subr.bf16.mxu1 %v2426_v0 }
  0x8c   :  { %2144 = vmatmul.mubr.f32.vlgmr.msra.gmra.mrb[2].mxu0 %v2504_v22 }
  0x8d   :  { %2186 = vmatmul.mubr.f32.vlgmr.msra.gmra.mrb[2].mxu1 %v2504_v22  ;;  %2252 = vmatpush3.bf16.xpose.msra.mxu0 %v2251_v8 }
  0x8e   :  { %2270 = vmatpush3.bf16.xpose.msra.mxu1 %v2269_v9  ;;  %2150 = vmatprep.mubr.msk.f32.mxu0 %vm2427_vm0, %v2428_v1 }
  0x8f   :  { %2192 = vmatprep.mubr.msk.f32.mxu1 %vm2427_vm0, %v2428_v1  ;;  %2253 = vmatprep.subr.bf16.mxu0 %v2426_v0 }
  0x90   :  { %2271 = vmatprep.subr.bf16.mxu1 %v2426_v0 }
  0x94   :  { %2151 = vmatmul.mubr.f32.vlgmr.msra.gmra.mrb[2].mxu0 %v2492_v11 }
  0x95   :  { %2193 = vmatmul.mubr.f32.vlgmr.msra.gmra.mrb[2].mxu1 %v2492_v11  ;;  %2255 = vmatpush3.bf16.xpose.msra.mxu0 %v2239_v56 }
  0x96   :  { %2273 = vmatpush3.bf16.xpose.msra.mxu1 %v2257_v59  ;;  %2157 = vmatprep.mubr.msk.f32.mxu0 %vm2427_vm0, %v2428_v1 }
  0x97   :  { %2199 = vmatprep.mubr.msk.f32.mxu1 %vm2427_vm0, %v2428_v1 }
  0x9c   :  { %2158 = vmatmul.mubr.f32.vlgmr.msra.gmra.mrb[2].mxu0 %v2492_v11 }
  0x9d   :  { %2200 = vmatmul.mubr.f32.vlgmr.msra.gmra.mrb[2].mxu1 %v2492_v11 }
 0x13f   :  { %v512_v13 = vpop.f32.mrb[0].mxu0 }
 0x140   :  { %v523_v0 = vmul.f32 %v1958_v10, %v512_v13  ;;  %v982_v14 = vpop.f32.mrb[0].mxu1  ;;  %v2075_v15 = vpop.f32.mrb[1].mxu0 }
 0x141   :  { %v994_v16 = vmul.f32 %v1959_v12, %v982_v14  ;;  %v2117_v17 = vpop.f32.mrb[1].mxu1 }
 0x143   :  { %v995_v18 = vmax.f32 %v523_v0, %v994_v16 }
 0x16f   :  { %v1454_v20 = vpop.f32.mrb[2].mxu0 }
 0x170   :  { %v1466_v22 = vmul.f32 %v1960_v19, %v1454_v20  ;;  %v1926_v23 = vpop.f32.mrb[2].mxu1  ;;  %v2159_v24 = vpop.f32.mrb[3].mxu0 }
 0x171   :  { %v2201_v1 = vpop.f32.mrb[3].mxu1  ;;  %v1938_v11 = vmul.f32 %v1961_v21, %v1926_v23 }
 0x172   :  { %v1467_v25 = vmax.f32 %v995_v18, %v1466_v22 }
 0x174   :  { %v1939_v26 = vmax.f32 %v1467_v25, %v1938_v11 }
 0x176   :  { %1941 = vst.msk [vmem:[#allocation8] sm:$0x3] %vm1940_vm1, %v1939_v26 }
 0x177   :  { %2402 = shalt.err (!%p2399_p0)
}
 0x178   :  { %s2403_s27 = scalar_lea.hbm %s2624_s3, 32 }
 0x179   :  { %p2404_p1 = scmp.ne.s32.totalorder %s2624_s3, %s2403_s27  ;;  %p2407_p2 = scmp.lt.u32.totalorder %s2403_s27, %s2624_s3 }
 0x17b   :  { %p2409_p3 = pnand %p2407_p2, %p2404_p1 }
 0x17d   :  { %2412 = shalt.err (!%p2409_p3)
}
 0x17e   :  { %1951 = dma.vmem_to_hbm [thread:$0]  %s1949_s23, 32, %s2624_s3, [#allocation4]  }
 0x17f   :  { %2417 = dma.done.wait [#allocation4], 32  }
 0x180   :  { %2418 = vsyncadd [#allocation4], 4294967264 }
 0x181   :  { %1955 = vsyncpa [#allocation3], 1 }
 0x182   :  { %1956 = vsyncpa [#allocation6], 1 }
 0x183   :  { %1957 = vsyncpa [#allocation4], 1 }

</bundles_post_ra>
